<compile_context>
chip_gen: v7x
topology: tpu7x:2x2x1
jax: 0.10.0
libtpu: 0.0.40
codegen_flags: <defaults>
</compile_context>

<pallas_src>
from functools import partial

import jax
import jax.numpy as jnp
from jax.experimental import pallas as pl
from jax.experimental.pallas import tpu as pltpu


def _round_up(x, m):
    return (x + m - 1) // m * m


def _pow2_clip(x, lo, hi):
    v = lo
    while v < x and v < hi:
        v *= 2
    return v


def _vmem_limit_bytes():
    """Generation-aware VMEM budget (v5e/v6e: 128 MiB, v7x: 64 MiB per TC)."""
    cap = None
    try:
        get_info = getattr(pltpu, "get_tpu_info", None)
        if get_info is not None:
            cap = getattr(get_info(), "vmem_capacity_bytes", None)
    except Exception:
        cap = None
    if not cap:
        cap = 64 * 1024 * 1024  # conservative default (v7x per-TC physical VMEM)
    return int(min(int(cap) * 3 // 4, 100 * 1024 * 1024))


def _choose_tiles(n, vmem_budget):
    # Row (target) tile: power of two >= 32 (int8 sublane tile); aim for >=2 row
    # tiles so both v7x TensorCores get work on the "parallel" row axis.
    tm = _pow2_clip(-(-n // 2), 32, 256)
    # Source (column) tile: power-of-two multiple of 128 lanes; larger on chips
    # with more VMEM to amortize the ~0.35us/grid-step overhead.
    tn_cap = 1024 if vmem_budget >= 64 * 1024 * 1024 else 512
    tn = _pow2_clip(n, 128, tn_cap)
    n_pad = _round_up(n, max(tm, tn))
    return tm, tn, n_pad


# ---------------------------------------------------------------------------
# Kernel 1: row-tiled feature projection + packed attention-score projection.
#   h = x @ W   -> bf16 [TM, HCpad]     (halves HBM traffic / VMEM residency)
#   s = h @ A   -> f32  [TM, 128]       (A packs att_src|att_dst for all heads;
#                                        128 lanes -> dense, unmasked stores)
# ---------------------------------------------------------------------------
def _proj_kernel(x_ref, w_ref, a_ref, h_ref, s_ref):
    x = x_ref[...].astype(jnp.bfloat16)              # bf16 feed -> full-rate MXU
    w = w_ref[...].astype(jnp.bfloat16)
    h = jnp.dot(x, w, preferred_element_type=jnp.float32)
    h_ref[...] = h.astype(jnp.bfloat16)
    # tiny score matmul kept in f32 to preserve attention-score precision
    s_ref[...] = jnp.dot(h, a_ref[...], preferred_element_type=jnp.float32)


def _gat_project(x, w, a, *, tm, vmem_limit):
    n_pad, f_in = x.shape
    hc_pad = w.shape[1]
    return pl.pallas_call(
        _proj_kernel,
        out_shape=(jax.ShapeDtypeStruct((n_pad, hc_pad), jnp.bfloat16),
                   jax.ShapeDtypeStruct((n_pad, 128), jnp.float32)),
        grid_spec=pltpu.PrefetchScalarGridSpec(
            num_scalar_prefetch=0,
            grid=(n_pad // tm,),
            in_specs=[
                pl.BlockSpec((tm, f_in), lambda i: (i, 0)),       # x rows (tiled)
                pl.BlockSpec((f_in, hc_pad), lambda i: (0, 0)),   # W (resident)
                pl.BlockSpec((hc_pad, 128), lambda i: (0, 0)),    # A (resident)
            ],
            out_specs=(
                pl.BlockSpec((tm, hc_pad), lambda i: (i, 0)),     # h (bf16)
                pl.BlockSpec((tm, 128), lambda i: (i, 0)),        # s (lane-dense)
            ),
        ),
        compiler_params=pltpu.CompilerParams(
            dimension_semantics=("parallel",),
            vmem_limit_bytes=vmem_limit),
    )(x, w, a)


# ---------------------------------------------------------------------------
# Kernel 2: block-sparse, source-tiled masked-softmax attention + aggregation.
#   grid = (target row tile i [parallel], non-empty source block k [arbitrary])
#   Online softmax with running max / denom / accumulator in VMEM scratch.
# ---------------------------------------------------------------------------
def _attn_kernel(counts_ref, blk_ref, sdst_ref, ssrcT_ref, h_ref, mask_ref,
                 bias_ref, out_ref, m_sc, l_sc, acc_sc,
                 *, heads, out_ch, concat, apply_elu):
    del blk_ref  # only used inside the index_maps
    i = pl.program_id(0)
    k = pl.program_id(1)
    hc_pad = acc_sc.shape[-1]
    C = out_ch

    def _cols(hd):
        # head hd's channel slice; the last head absorbs the zero lane padding
        # (its extra columns of h are zero, so they aggregate to exactly 0).
        lo = hd * C
        hi = (hd + 1) * C if hd + 1 < heads else hc_pad
        return lo, hi

    @pl.when(k == 0)
    def _():
        m_sc[...] = jnp.full(m_sc.shape, -1e30, jnp.float32)
        l_sc[...] = jnp.zeros(l_sc.shape, jnp.float32)
        acc_sc[...] = jnp.zeros(acc_sc.shape, jnp.float32)

    @pl.when(k < counts_ref[i])                    # skip all-zero mask blocks
    def _():
        # additive mask bias on the small (TM, TN) tile, shared by all heads
        neg = (mask_ref[...].astype(jnp.float32) - 1.0) * jnp.float32(1e30)
        h_src = h_ref[...]                         # bf16 [TN, HCpad]
        s_dst = sdst_ref[...]                      # f32  [TM, heads]
        for hd in range(heads):                    # small static unroll
            lo, hi = _cols(hd)
            e = s_dst[:, hd:hd + 1] + ssrcT_ref[hd:hd + 1, :]       # [TM, TN]
            e = jnp.maximum(e, 0.2 * e) + neg                       # leaky_relu + mask
            m_old = m_sc[:, hd:hd + 1]
            m_new = jnp.maximum(m_old, jnp.max(e, axis=-1, keepdims=True))
            a = jnp.exp(m_old - m_new)
            p = jnp.exp(e - m_new)
            l_sc[:, hd:hd + 1] = a * l_sc[:, hd:hd + 1] + jnp.sum(p, -1, keepdims=True)
            agg = jnp.dot(p.astype(jnp.bfloat16), h_src[:, lo:hi],
                          preferred_element_type=jnp.float32)       # MXU, f32 acc
            acc_sc[:, lo:hi] = a * acc_sc[:, lo:hi] + agg
            m_sc[:, hd:hd + 1] = m_new

    @pl.when(k == pl.num_programs(1) - 1)
    def _():
        # rows with no edges (only padded rows) keep l == 0 -> clamp, no NaN/Inf
        inv = pl.reciprocal(jnp.maximum(l_sc[...], 1e-30), approx=True)  # EUP vrcp
        if concat:
            for hd in range(heads):
                lo, hi = _cols(hd)
                v = acc_sc[:, lo:hi] * inv[:, hd:hd + 1] + bias_ref[:, lo:hi]
                if apply_elu:
                    v = jnp.maximum(v, 0.0) + (jnp.exp(jnp.minimum(v, 0.0)) - 1.0)
                out_ref[:, lo:hi] = v.astype(out_ref.dtype)
        else:
            # concat=False is only used with heads == 1 in this model (conv2);
            # padded output lanes stay exactly 0 (zero-padded W2/bias2).
            v = acc_sc[...] * inv[:, 0:1] + bias_ref[...]
            if apply_elu:
                v = jnp.maximum(v, 0.0) + (jnp.exp(jnp.minimum(v, 0.0)) - 1.0)
            out_ref[...] = v.astype(out_ref.dtype)


def _gat_attention(s, h, mask, bias, counts, blk_tbl, *, heads, out_ch, concat,
                   apply_elu, tm, tn, vmem_limit):
    if not concat and heads != 1:
        raise NotImplementedError("concat=False path implemented for heads == 1 only")
    n_pad, hc_pad = h.shape
    s_dst = s[:, heads:2 * heads]                    # [Npad, heads]
    s_src_t = jnp.transpose(s[:, :heads])            # [heads, Npad] (one transpose)
    n_row = n_pad // tm
    max_blk = blk_tbl.shape[1]

    kernel = partial(_attn_kernel, heads=heads, out_ch=out_ch,
                     concat=concat, apply_elu=apply_elu)
    return pl.pallas_call(
        kernel,
        out_shape=jax.ShapeDtypeStruct((n_pad, hc_pad), jnp.float32),
        grid_spec=pltpu.PrefetchScalarGridSpec(
            num_scalar_prefetch=2,                   # counts, block table (SMEM)
            grid=(n_row, max_blk),
            in_specs=[
                pl.BlockSpec((tm, heads), lambda i, k, cnt, blk: (i, 0)),
                pl.BlockSpec((heads, tn), lambda i, k, cnt, blk: (0, blk[i, k])),
                pl.BlockSpec((tn, hc_pad), lambda i, k, cnt, blk: (blk[i, k], 0)),
                pl.BlockSpec((tm, tn), lambda i, k, cnt, blk: (i, blk[i, k])),
                pl.BlockSpec((1, hc_pad), lambda i, k, cnt, blk: (0, 0)),
            ],
            out_specs=pl.BlockSpec((tm, hc_pad), lambda i, k, cnt, blk: (i, 0)),
            scratch_shapes=[
                pltpu.VMEM((tm, heads), jnp.float32),    # running max (per head)
                pltpu.VMEM((tm, heads), jnp.float32),    # running denominator
                pltpu.VMEM((tm, hc_pad), jnp.float32),   # running weighted sum
            ],
        ),
        compiler_params=pltpu.CompilerParams(
            dimension_semantics=("parallel", "arbitrary"),
            vmem_limit_bytes=vmem_limit),
    )(counts, blk_tbl, s_dst, s_src_t, h, mask, bias)


# ---------------------------------------------------------------------------
# Graph preprocessing & parameter init (host / XLA side, done once).
# ---------------------------------------------------------------------------
def build_adjacency_mask(edge_index, num_nodes, num_nodes_pad):
    """Dense int8 [Npad, Npad] mask, mask[i, j] = 1 iff edge j->i, with self-loops
    for the real nodes (PyG add_self_loops=True default)."""
    src = edge_index[0]
    dst = edge_index[1]
    loops = jnp.arange(num_nodes, dtype=edge_index.dtype)
    src = jnp.concatenate([src, loops])
    dst = jnp.concatenate([dst, loops])
    mask = jnp.zeros((num_nodes_pad, num_nodes_pad), jnp.int8)
    return mask.at[dst, src].set(1)


def _build_block_schedule(mask, tm, tn):
    """Per-row-tile list of NON-EMPTY source blocks (block-sparse tile skip)."""
    n_pad = mask.shape[0]
    n_row, n_col = n_pad // tm, n_pad // tn
    nz = mask.reshape(n_row, tm, n_col, tn).astype(jnp.int32).sum(axis=(1, 3)) > 0
    counts = nz.sum(axis=1).astype(jnp.int32)                      # [n_row]
    col = jnp.arange(n_col, dtype=jnp.int32)[None, :]
    order = jnp.argsort(jnp.where(nz, col, col + n_col), axis=1).astype(jnp.int32)
    max_blk = max(int(jnp.max(counts)), 1)
    # pad each row's list by repeating its last valid block: the pipeline sees an
    # unchanged block index on the padded (skipped) steps and elides the DMA.
    idx = jnp.minimum(jnp.arange(max_blk, dtype=jnp.int32)[None, :],
                      jnp.maximum(counts[:, None] - 1, 0))
    blk_tbl = jnp.take_along_axis(order, idx, axis=1).astype(jnp.int32)
    return counts, blk_tbl


def init_gat_params(key, in_channels, hidden_channels, out_channels, heads):
    """Deterministic glorot-style init matching GATConv parameter shapes."""
    k = jax.random.split(key, 8)

    def glorot(rng, shape):
        fan_in, fan_out = shape[0], shape[-1]
        limit = (6.0 / (fan_in + fan_out)) ** 0.5
        return jax.random.uniform(rng, shape, jnp.float32, -limit, limit)

    return {
        # conv1: GATConv(in_channels, hidden_channels, heads), concat=True
        "w1": glorot(k[0], (in_channels, heads * hidden_channels)),
        "att_src1": glorot(k[1], (heads, hidden_channels)),
        "att_dst1": glorot(k[2], (heads, hidden_channels)),
        "bias1": jnp.zeros((1, heads * hidden_channels), jnp.float32),
        # conv2: GATConv(heads*hidden, out_channels, heads=1, concat=False)
        "w2": glorot(k[3], (heads * hidden_channels, out_channels)),
        "att_src2": glorot(k[4], (1, out_channels)),
        "att_dst2": glorot(k[5], (1, out_channels)),
        "bias2": jnp.zeros((1, out_channels), jnp.float32),
    }


def _pack_att(att_src, att_dst, heads, c, hc_pad):
    """[HCpad, 128]: column hd <- att_src[hd], column heads+hd <- att_dst[hd]."""
    a = jnp.zeros((hc_pad, 128), jnp.float32)
    for hd in range(heads):
        a = a.at[hd * c:(hd + 1) * c, hd].set(att_src[hd])
        a = a.at[hd * c:(hd + 1) * c, heads + hd].set(att_dst[hd])
    return a


def gat_forward(params, x, edge_index, *, hidden_channels, out_channels, heads):
    n, f_in = x.shape
    vmem = _vmem_limit_bytes()
    tm, tn, n_pad = _choose_tiles(n, vmem)

    hc1 = heads * hidden_channels
    hc1_pad = _round_up(hc1, 128)
    out_pad = _round_up(out_channels, 128)

    x_p = jnp.zeros((n_pad, f_in), jnp.float32).at[:n].set(x.astype(jnp.float32))
    mask = build_adjacency_mask(edge_index, n, n_pad)       # int8, shared by both layers
    counts, blk_tbl = _build_block_schedule(mask, tm, tn)

    # zero lane padding of the parameters keeps all padded output lanes exactly 0
    w1 = jnp.zeros((f_in, hc1_pad), jnp.float32).at[:, :hc1].set(params["w1"])
    b1 = jnp.zeros((1, hc1_pad), jnp.float32).at[:, :hc1].set(params["bias1"])
    a1 = _pack_att(params["att_src1"], params["att_dst1"], heads, hidden_channels, hc1_pad)
    w2 = jnp.zeros((hc1_pad, out_pad), jnp.float32).at[:hc1, :out_channels].set(params["w2"])
    b2 = jnp.zeros((1, out_pad), jnp.float32).at[:, :out_channels].set(params["bias2"])
    a2 = _pack_att(params["att_src2"], params["att_dst2"], 1, out_channels, out_pad)

    # ---- layer 1: GATConv(in, hidden, heads) + ELU; dropout(p=0.6) is identity
    #      in eval mode ----
    h1p, s1 = _gat_project(x_p, w1, a1, tm=tm, vmem_limit=vmem)
    h1 = _gat_attention(s1, h1p, mask, b1, counts, blk_tbl,
                        heads=heads, out_ch=hidden_channels, concat=True,
                        apply_elu=True, tm=tm, tn=tn, vmem_limit=vmem)

    # ---- layer 2: GATConv(heads*hidden, out, heads=1, concat=False) ----
    h2p, s2 = _gat_project(h1, w2, a2, tm=tm, vmem_limit=vmem)
    out = _gat_attention(s2, h2p, mask, b2, counts, blk_tbl,
                         heads=1, out_ch=out_channels, concat=False,
                         apply_elu=False, tm=tm, tn=tn, vmem_limit=vmem)
    # TODO(synk): return_attention_weights=True path (explicit per-edge alphas) not
    #             implemented; only the default forward is reproduced.
    return out[:n, :out_channels]


if __name__ == "__main__":
    # Small, deterministic problem.
    num_nodes = 16
    in_channels = 8
    hidden_channels = 8
    heads = 2
    out_channels = 4
    num_edges = 40

    key = jax.random.PRNGKey(0)
    k_x, k_src, k_dst, k_param = jax.random.split(key, 4)

    x = jax.random.normal(k_x, (num_nodes, in_channels), jnp.float32)
    src = jax.random.randint(k_src, (num_edges,), 0, num_nodes, jnp.int32)
    dst = jax.random.randint(k_dst, (num_edges,), 0, num_nodes, jnp.int32)
    edge_index = jnp.stack([src, dst], axis=0)   # [2, E], row 0 = source, row 1 = target

    params = init_gat_params(k_param, in_channels, hidden_channels, out_channels, heads)

    out = gat_forward(params, x, edge_index,
                      hidden_channels=hidden_channels,
                      out_channels=out_channels,
                      heads=heads)
    out = jax.block_until_ready(out)

    assert out.shape == (num_nodes, out_channels)
    assert bool(jnp.all(jnp.isfinite(out)))
    print("KERNEL_OK")
</pallas_src>

<mosaic_0001>
module attributes {stable_mosaic.version = 11 : i64} {
  func.func @_proj_kernel(%arg0: i32, %arg1: memref<32x8xf32, #tpu.memory_space<vmem>>, %arg2: memref<8x128xf32, #tpu.memory_space<vmem>>, %arg3: memref<128x128xf32, #tpu.memory_space<vmem>>, %arg4: memref<32x128xbf16, #tpu.memory_space<vmem>>, %arg5: memref<32x128xf32, #tpu.memory_space<vmem>>) attributes {dimension_semantics = [#tpu.dimension_semantics<parallel>], iteration_bounds = array<i64: 4>, scalar_prefetch = 0 : i64, scratch_operands = 0 : i64, tpu.core_type = #tpu.core_type<tc>, window_params = [{transform_indices = @transform_0, window_bounds = array<i64: 32, 8>}, {pipeline_mode = #tpu.pipeline_mode<synchronous>, transform_indices = @transform_1, window_bounds = array<i64: 8, 128>}, {pipeline_mode = #tpu.pipeline_mode<synchronous>, transform_indices = @transform_2, window_bounds = array<i64: 128, 128>}, {transform_indices = @transform_3, window_bounds = array<i64: 32, 128>}, {transform_indices = @transform_4, window_bounds = array<i64: 32, 128>}]} {
    %c0 = arith.constant 0 : index
    %c0_0 = arith.constant 0 : index
    %0 = vector.load %arg1[%c0, %c0_0] : memref<32x8xf32, #tpu.memory_space<vmem>>, vector<32x8xf32>
    %1 = arith.truncf %0 : vector<32x8xf32> to vector<32x8xbf16>
    %c0_1 = arith.constant 0 : index
    %c0_2 = arith.constant 0 : index
    %2 = vector.load %arg2[%c0_1, %c0_2] : memref<8x128xf32, #tpu.memory_space<vmem>>, vector<8x128xf32>
    %3 = arith.truncf %2 : vector<8x128xf32> to vector<8x128xbf16>
    %cst = arith.constant dense<0.000000e+00> : vector<32x128xf32>
    %4 = tpu.matmul %1, %3, %cst {dimension_numbers = #tpu.dot_dimension_numbers<[1], [0], [0], [1], [0, 0, 1, 1], [], []>} : vector<32x8xbf16>, vector<8x128xbf16>, vector<32x128xf32> -> vector<32x128xf32>
    %5 = arith.truncf %4 : vector<32x128xf32> to vector<32x128xbf16>
    %c0_3 = arith.constant 0 : index
    %c0_4 = arith.constant 0 : index
    %6 = vector.load %arg4[%c0_3, %c0_4] : memref<32x128xbf16, #tpu.memory_space<vmem>>, vector<32x128xbf16>
    tpu.vector_store %arg4[%c0_3, %c0_4], %5 {strides = array<i32>} : memref<32x128xbf16, #tpu.memory_space<vmem>>, vector<32x128xbf16>,
    %c0_5 = arith.constant 0 : index
    %c0_6 = arith.constant 0 : index
    %7 = vector.load %arg3[%c0_5, %c0_6] : memref<128x128xf32, #tpu.memory_space<vmem>>, vector<128x128xf32>
    %cst_7 = arith.constant dense<0.000000e+00> : vector<32x128xf32>
    %8 = tpu.matmul %4, %7, %cst_7 {dimension_numbers = #tpu.dot_dimension_numbers<[1], [0], [0], [1], [0, 0, 1, 1], [], []>} : vector<32x128xf32>, vector<128x128xf32>, vector<32x128xf32> -> vector<32x128xf32>
    %c0_8 = arith.constant 0 : index
    %c0_9 = arith.constant 0 : index
    %9 = vector.load %arg5[%c0_8, %c0_9] : memref<32x128xf32, #tpu.memory_space<vmem>>, vector<32x128xf32>
    tpu.vector_store %arg5[%c0_8, %c0_9], %8 {strides = array<i32>} : memref<32x128xf32, #tpu.memory_space<vmem>>, vector<32x128xf32>,
    return
  }
  func.func @transform_0(%arg0: i32) -> (i32, i32) {
    %c0_i32 = arith.constant 0 : i32
    %c0_i32_0 = arith.constant 0 : i32
    return %arg0, %c0_i32 : i32, i32
  }
  func.func @transform_1(%arg0: i32) -> (i32, i32) {
    %c0_i32 = arith.constant 0 : i32
    %c0_i32_0 = arith.constant 0 : i32
    %c0_i32_1 = arith.constant 0 : i32
    return %c0_i32, %c0_i32_0 : i32, i32
  }
  func.func @transform_2(%arg0: i32) -> (i32, i32) {
    %c0_i32 = arith.constant 0 : i32
    %c0_i32_0 = arith.constant 0 : i32
    %c0_i32_1 = arith.constant 0 : i32
    return %c0_i32, %c0_i32_0 : i32, i32
  }
  func.func @transform_3(%arg0: i32) -> (i32, i32) {
    %c0_i32 = arith.constant 0 : i32
    %c0_i32_0 = arith.constant 0 : i32
    return %arg0, %c0_i32 : i32, i32
  }
  func.func @transform_4(%arg0: i32) -> (i32, i32) {
    %c0_i32 = arith.constant 0 : i32
    %c0_i32_0 = arith.constant 0 : i32
    return %arg0, %c0_i32 : i32, i32
  }
}

</mosaic_0001>

<bundles_post_ra>
// kernel: tpu_custom_call.1
= control target key start
LH: loop header
LB: loop body
LE: loop exit
PB: predicated region body
PF: predicated region fallthrough
CT: control target
= control target key end

     0   :  { %10 = vsyncpa [#allocation3], 0  ;;  %s1037_s0 = inlined_call_operand.vmem [shape: f32[128,8], index: 0, kind: input, shape index: {}]   ;;  %s1038_s1 = inlined_call_operand.vmem [shape: f32[8,128], index: 1, kind: input, shape index: {}]   ;;  %s1039_s2 = inlined_call_operand.vmem [shape: f32[128,128], index: 2, kind: input, shape index: {}]   ;;  %s1040_s3 = inlined_call_operand.hbm [shape: bf16[128,128], index: 3, kind: output, shape index: {0}]   ;;  %s1041_s4 = inlined_call_operand.hbm [shape: f32[128,128], index: 4, kind: output, shape index: {1}]  }
   0x1   :  { %12 = vsyncpa [#allocation3 + $0x1], 0 }
   0x2   :  { %13 = vsyncpa [#allocation5], 0 }
   0x3   :  { %15 = vsyncpa [#allocation5 + $0x1], 0  ;;  %s848_s15 = smov 0   ;;  %s850_s16 = smov 0  }
   0x4   :  { %s852_s17 = smov 0   ;;  %s854_s18 = smov 0  }
   0x5 LB: > { %s869_s19 = sadd.s32 4294967295, %s815_s18   ;;  %s534_s20 = sadd.s32 4294967294, %s815_s18   ;;  %s815_s18 = sphi %s854_s18, %s1047_s18   ;;  %s811_s17 = sphi %s852_s17, %s1046_s17   ;;  %s807_s16 = sphi %s850_s16, %s1045_s16   ;;  %s803_s15 = sphi %s848_s15, %s1044_s15  }
   0x6   : > { %s873_s21 = sadd.s32 1, %s815_s18   ;;  %s96_s22 = sadd.s32 1, %s811_s17 }
   0x7   : > { %s93_s23 = ssub.s32 %s815_s18, %s873_s21  ;;  %p106_p0 = scmp.ne.s32.totalorder %s811_s17, %s807_s16 }
   0x8   : > { %p94_p1 = scmp.eq.s32.totalorder %s93_s23, 0  ;;  %p107_p2 = scmp.eq.s32.totalorder %s869_s19, 3 }
   0x9   : > { %p112_p3 = scmp.ne.s32.totalorder %s807_s16, %s803_s15  ;;  %p113_p4 = scmp.eq.s32.totalorder %s534_s20, 3 }
   0xa   : > { %s884_s24 = scalar_select %p94_p1, %s811_s17, %s96_s22  }
   0xb   : > { %p886_p5 = por %p107_p2, %p106_p0  ;;  %p890_p6 = por %p113_p4, %p112_p3 }
   0xc   : > { %p537_p7 = scmp.ge.s32.totalorder %s815_s18, 1  ;;  %p172_p8 = scmp.lt.s32.totalorder %s815_s18, 5 }
   0xe   : > { %p173_p9 = pnand %p537_p7, %p172_p8 }
   0xf   : > { %v218_v0 = vld [vmem:[%s1038_s1] sm:$0xff] (!%p173_p9)  ;;  %vm227_vm0 = vcmask (!%p173_p9), 1043456   ;;  %s540_s29 = sshll.u32 (!%p173_p9), %s869_s19, 2  ;;  %v301_v2 = vld [vmem:[%s1039_s2 + $0x8] sm:$0xff] (!%p173_p9)  ;;  %v302_v5 = vld [vmem:[%s1039_s2 + $0x10] sm:$0xff] (!%p173_p9)  ;;  %vm220_vm1 = vcmask (!%p173_p9), 64512  }
  0x10   : > { %176 = sbr.rel (%p173_p9) target bundleno = 477 (0x1dd), region = 32  ;;  %v300_v1 = vld [vmem:[%s1039_s2] sm:$0xff] (!%p173_p9)  ;;  %v219_v3 = vpack.c.bf16 (!%p173_p9), %v218_v0, %v218_v0  ;;  %p204_p10 = scmp.lt.s32.totalorder (!%p173_p9), %s540_s29, 15  ;;  %v303_v6 = vld [vmem:[%s1039_s2 + $0x18] sm:$0xff] (!%p173_p9)  ;;  %v305_v9 = vld [vmem:[%s1039_s2 + $0x28] sm:$0xff] (!%p173_p9) }
  0x11   : > { %v640_v4 = vpack.c.bf16 (!%p173_p9), %v301_v2, %v300_v1  ;;  %v644_v7 = vpack.c.bf16 (!%p173_p9), %v303_v6, %v302_v5  ;;  %v304_v8 = vld [vmem:[%s1039_s2 + $0x20] sm:$0xff] (!%p173_p9)  ;;  %v306_v12 = vld [vmem:[%s1039_s2 + $0x30] sm:$0xff] (!%p173_p9)  ;;  %v307_v13 = vld [vmem:[%s1039_s2 + $0x38] sm:$0xff] (!%p173_p9)  ;;  %s952_s7 = sand.u32 (!%p173_p9), 1, %s807_s16   ;;  %s560_s10 = sshll.u32 (!%p173_p9), %s869_s19, 8 }
  0x12   : > { %672 = vmatprep.subr.msk.bf16.mxu0 (!%p173_p9), %vm227_vm0, %v219_v3  ;;  %v229_v10 = vsel (!%p173_p9), %vm227_vm0, %v219_v3, 0  ;;  %v648_v11 = vpack.c.bf16 (!%p173_p9), %v305_v9, %v304_v8  ;;  %v652_v20 = vpack.c.bf16 (!%p173_p9), %v307_v13, %v306_v12  ;;  %v308_v21 = vld [vmem:[%s1039_s2 + $0x40] sm:$0xff] (!%p173_p9)  ;;  %v309_v22 = vld [vmem:[%s1039_s2 + $0x48] sm:$0xff] (!%p173_p9)  ;;  %v310_v24 = vld [vmem:[%s1039_s2 + $0x50] sm:$0xff] (!%p173_p9)  ;;  %s961_s13 = scalar_lea.hbm (!%p173_p9), %s1040_s3, %s560_s10  ;;  %s406_s14 = scalar_lea.sflag (!%p173_p9), [#allocation3], %s952_s7 }
  0x13   : > { %641 = vmatprep.subr.bf16.mxu1 (!%p173_p9), %v640_v4  ;;  %597 = vmatpush3.bf16.msra.mxu0 (!%p173_p9), %v229_v10  ;;  %v656_v23 = vpack.c.bf16 (!%p173_p9), %v309_v22, %v308_v21  ;;  %v311_v25 = vld [vmem:[%s1039_s2 + $0x58] sm:$0xff] (!%p173_p9)  ;;  %v312_v27 = vld [vmem:[%s1039_s2 + $0x60] sm:$0xff] (!%p173_p9)  ;;  %v313_v28 = vld [vmem:[%s1039_s2 + $0x68] sm:$0xff] (!%p173_p9) }
  0x14   : > { %643 = vmatpush3.bf16.msra.mxu1 (!%p173_p9), %v640_v4  ;;  %v660_v26 = vpack.c.bf16 (!%p173_p9), %v311_v25, %v310_v24  ;;  %v664_v29 = vpack.c.bf16 (!%p173_p9), %v313_v28, %v312_v27  ;;  %v314_v30 = vld [vmem:[%s1039_s2 + $0x70] sm:$0xff] (!%p173_p9)  ;;  %v315_v31 = vld [vmem:[%s1039_s2 + $0x78] sm:$0xff] (!%p173_p9) }
  0x15   : > { %645 = vmatprep.subr.bf16.mxu1 (!%p173_p9), %v644_v7  ;;  %v668_v32 = vpack.c.bf16 (!%p173_p9), %v315_v31, %v314_v30 }
  0x17   : > { %s1049_s29 = smov (!%p204_p10, %s540_s29), 15 }
  0x18   : > { %s541_s22 = sshll.u32 %s1049_s29, 3  ;;  %647 = vmatpush3.bf16.msra.mxu1 %v644_v7  ;;  %s538_s29 = sshll.u32 %s952_s7, 4 }
  0x19   : > { %s207_s28 = scalar_lea.vmem %s1037_s0, %s541_s22  ;;  %649 = vmatprep.subr.bf16.mxu1 %v648_v11  ;;  %s195_s8 = scalar_lea.vmem [#allocation2], %s538_s29 }
  0x1a   : > { %v212_v14 = vld [vmem:[%s207_s28] sm:$0xff]  ;;  %v213_v15 = vld [vmem:[%s207_s28 + $0x8] sm:$0xff]  ;;  %v214_v16 = vld [vmem:[%s207_s28 + $0x10] sm:$0xff]  ;;  %s424_s9 = sshll.u32 %s195_s8, 4  ;;  %s817_s22 = smov [#allocation2]   ;;  %s955_s9 = int_to_ptr.vmem [resolvable:$true] %s424_s9 }
  0x1b   : > { %v216_v17 = vpack.c.bf16 %v213_v15, %v212_v14  ;;  %v215_v18 = vld [vmem:[%s207_s28 + $0x18] sm:$0xff]  ;;  %s721_s20 = scalar_lea.vmem %s955_s9, 256  ;;  %s725_s23 = sshll.u32 %s817_s22, 4  ;;  %s726_s23 = int_to_ptr.vmem [resolvable:$false] %s725_s23 }
  0x1c   : > { %v217_v19 = vpack.c.bf16 %v215_v18, %v214_v16  ;;  %651 = vmatpush3.bf16.msra.mxu1 %v648_v11  ;;  %p722_p11 = scmp.ne.s32.totalorder %s955_s9, %s721_s20  ;;  %s727_s27 = scalar_lea.vmem %s726_s23, 512 }
  0x1d   : > { %598 = vmatprep.mubr.msk.bf16.mxu0 %vm220_vm1, %v216_v17  ;;  %653 = vmatprep.subr.bf16.mxu1 %v652_v20  ;;  %p728_p0 = scmp.lt.s32.totalorder %s955_s9, %s726_s23  ;;  %p729_p1 = scmp.lt.s32.totalorder %s727_s27, %s721_s20 }
  0x1e   : > { %599 = vmatmul.mubr.msk.bf16.vlgmr.msra.gmra.mrb[0].mxu0 %vm220_vm1, %v217_v19  ;;  %p723_p12 = pnand %p722_p11, %p886_p5 }
  0x1f   : > { %p730_p2 = por %p729_p1, %p728_p0 }
  0x20   : > { %655 = vmatpush3.bf16.msra.mxu1 %v652_v20  ;;  %p724_p13 = pneg %p723_p12 }
  0x21   : > { %657 = vmatprep.subr.bf16.mxu1 %v656_v23 }
  0x22   : > { %p731_p3 = pnand %p730_p2, %p724_p13 }
  0x24   : > { %659 = vmatpush3.bf16.msra.mxu1 %v656_v23 }
  0x25   : > { %661 = vmatprep.subr.bf16.mxu1 %v660_v26 }
  0x28   : > { %663 = vmatpush3.bf16.msra.mxu1 %v660_v26 }
  0x29   : > { %665 = vmatprep.subr.bf16.mxu1 %v664_v29 }
  0x2c   : > { %667 = vmatpush3.bf16.msra.mxu1 %v664_v29 }
  0x2d   : > { %669 = vmatprep.subr.bf16.mxu1 %v668_v32 }
  0x30   : > { %671 = vmatpush3.bf16.msra.mxu1 %v668_v32 }
  0xf1   : > { %v600_v33 = vpop.f32.mrb[0].mxu0 }
  0xf2   : > { %v265_v34 = vpop.f32.mrb[1].mxu0 }
  0xf3   : > { %v601_v35 = vpop.f32.mrb[2].mxu0  ;;  %634 = vmatprep.mubr.f32.mxu1 %v265_v34 }
  0xf4   : > { %v570_v36 = vpack.c.bf16 %v601_v35, %v600_v33  ;;  %v268_v37 = vpop.f32.mrb[3].mxu0 }
  0xf5   : > { %v565_v38 = vpack.c.bf16 %v268_v37, %v265_v34  ;;  %635 = vmatmul.mubr.f32.vlgmr.msra.gmra.mrb[0].mxu1 %v268_v37 }
  0xf6   : > { %572 = vst [vmem:[%s195_s8 + $0x8] sm:$0xff] %v570_v36   ;;  %637 = vmatprep.mubr.f32.mxu1 %v600_v33 }
  0xf7   : > { %566 = vst [vmem:[%s195_s8] sm:$0xff] %v565_v38  }
  0xf9   : > { %638 = vmatmul.mubr.f32.gmra.mrb[2].mxu1 %v601_v35 }
  0xfa   : > { %734 = shalt.err (!%p731_p3)
}
  0xfb   : > { %s735_s28 = scalar_lea.hbm %s961_s13, 256  ;;  %s739_s6 = scalar_lea.hbm %s1040_s3, 1024 }
  0xfc   : > { %p736_p4 = scmp.ne.s32.totalorder %s961_s13, %s735_s28  ;;  %p740_p9 = scmp.lt.u32.totalorder %s961_s13, %s1040_s3 }
  0xfd   : > { %p741_p10 = scmp.lt.u32.totalorder %s739_s6, %s735_s28  ;;  %p743_p12 = scmp.lt.u32.totalorder %s735_s28, %s961_s13 }
  0xfe   : > { %p737_p7 = pnand %p736_p4, %p886_p5 }
  0xff   : > { %p742_p11 = por %p741_p10, %p740_p9 }
 0x100   : > { %p738_p8 = pneg %p737_p7 }
 0x101   : > { %p744_p13 = por %p743_p12, %p742_p11 }
 0x103   : > { %p745_p0 = pnand %p744_p13, %p738_p8 }
 0x105   : > { %748 = shalt.err (!%p745_p0)
}
 0x106   : > { %s818_s10 = smov 64   ;;  %s819_s11 = smov 4  }
 0x107   : > { %673 = dma.vmem_to_hbm [thread:$0]  (%p886_p5), %s955_s9, 256, %s961_s13, %s406_s14, %s818_s10, %s818_s10, %s819_s11  }
 0x108   : > { %s539_s12 = sshll.u32 %s952_s7, 5  ;;  %s561_s23 = sshll.u32 %s869_s19, 9 }
 0x109   : > { %s202_s20 = scalar_lea.vmem [#allocation4], %s539_s12  ;;  %s994_s30 = scalar_lea.hbm %s1041_s4, %s561_s23 }
 0x10a   : > { %s440_s22 = sshll.u32 %s202_s20, 4  ;;  %s411_s9 = scalar_lea.sflag [#allocation5], %s952_s7  ;;  %s989_s22 = int_to_ptr.vmem [resolvable:$true] %s440_s22 }
 0x10b   : > { %s749_s13 = scalar_lea.vmem %s989_s22, 512  ;;  %s820_s19 = smov [#allocation4]  }
 0x10c   : > { %p750_p1 = scmp.ne.s32.totalorder %s989_s22, %s749_s13  ;;  %s753_s14 = sshll.u32 %s820_s19, 4  ;;  %s754_s14 = int_to_ptr.vmem [resolvable:$false] %s753_s14 }
 0x10d   : > { %s755_s5 = scalar_lea.vmem %s754_s14, 1024  ;;  %p756_p4 = scmp.lt.s32.totalorder %s989_s22, %s754_s14 }
 0x10e   : > { %p751_p2 = pnand %p750_p1, %p886_p5  ;;  %p757_p7 = scmp.lt.s32.totalorder %s755_s5, %s749_s13 }
 0x110   : > { %p752_p3 = pneg %p751_p2  ;;  %p758_p8 = por %p757_p7, %p756_p4 }
 0x112   : > { %p759_p9 = pnand %p758_p8, %p752_p3 }
 0x1c8   : > { %v636_v39 = vpop.f32.mrb[0].mxu1 }
 0x1c9   : > { %402 = vst [vmem:[%s202_s20 + $0x8] sm:$0xff] %v636_v39  ;;  %v382_v40 = vpop.f32.mrb[1].mxu1 }
 0x1ca   : > { %401 = vst [vmem:[%s202_s20] sm:$0xff] %v382_v40 }
 0x1cc   : > { %v639_v41 = vpop.f32.mrb[2].mxu1 }
 0x1cd   : > { %404 = vst [vmem:[%s202_s20 + $0x18] sm:$0xff] %v639_v41  ;;  %v392_v42 = vpop.f32.mrb[3].mxu1 }
 0x1ce   : > { %403 = vst [vmem:[%s202_s20 + $0x10] sm:$0xff] %v392_v42 }
 0x1cf   : > { %762 = shalt.err (!%p759_p9)
}
 0x1d0   : > { %s763_s6 = scalar_lea.hbm %s994_s30, 512  ;;  %s767_s10 = scalar_lea.hbm %s1041_s4, 2048 }
 0x1d1   : > { %p764_p10 = scmp.ne.s32.totalorder %s994_s30, %s763_s6  ;;  %p768_p13 = scmp.lt.u32.totalorder %s994_s30, %s1041_s4 }
 0x1d2   : > { %p769_p0 = scmp.lt.u32.totalorder %s767_s10, %s763_s6  ;;  %p771_p2 = scmp.lt.u32.totalorder %s763_s6, %s994_s30 }
 0x1d3   : > { %p765_p11 = pnand %p764_p10, %p886_p5 }
 0x1d4   : > { %p770_p1 = por %p769_p0, %p768_p13 }
 0x1d5   : > { %p766_p12 = pneg %p765_p11 }
 0x1d6   : > { %p772_p3 = por %p771_p2, %p770_p1 }
 0x1d8   : > { %p773_p4 = pnand %p772_p3, %p766_p12 }
 0x1da   : > { %776 = shalt.err (!%p773_p4)
}
 0x1db   : > { %s821_s20 = smov 128   ;;  %s822_s23 = smov 8  }
 0x1dc   : > { %674 = dma.vmem_to_hbm [thread:$0]  (%p886_p5), %s989_s22, 512, %s994_s30, %s411_s9, %s821_s20, %s821_s20, %s822_s23  }
 0x1dd PF: > { %p684_p7 = scmp.ge.s32.totalorder %s815_s18, 2  ;;  %s455_s27 = sand.u32 1, %s803_s15  }
 0x1de   : > { %s456_s28 = scalar_lea.sflag [#allocation3], %s455_s27 }
 0x1df   : > { %p678_p8 = pnand %p684_p7, %p890_p6 }
 0x1e1   : > { %794 = dma.done.wait (!%p678_p8), %s456_s28, 256  }
 0x1e2   : > { %796 = vsyncadd (!%p678_p8), %s456_s28, 4294967040  ;;  %s465_s13 = scalar_lea.sflag [#allocation5], %s455_s27 }
 0x1e3   : > { %798 = dma.done.wait (!%p678_p8), %s465_s13, 512  }
 0x1e4   : > { %800 = vsyncadd (!%p678_p8), %s465_s13, 4294966784  ;;  %p18_p5 = scmp.ge.s32.totalorder %s873_s21, 6   ;;  %s1044_s15 = smov %s807_s16 }
 0x1e5   : > { %s1045_s16 = smov %s811_s17  ;;  %s1046_s17 = smov %s884_s24 }
 0x1e6   : > { %s1047_s18 = smov %s873_s21  ;;  %20 = sbr.rel (!%p18_p5) target bundleno = 5 (0x5), region = 84 }
 0x1ed   :  { %470 = vsyncpa [#allocation3], 1 }
 0x1ee   :  { %472 = vsyncpa [#allocation3 + $0x1], 1 }
 0x1ef   :  { %473 = vsyncpa [#allocation5], 1 }
 0x1f0   :  { %475 = vsyncpa [#allocation5 + $0x1], 1 }

</bundles_post_ra>
